<compile_context>
chip_gen: v7x
topology: tpu7x:2x2x1
jax: 0.10.0
libtpu: 0.0.40
codegen_flags: <defaults>
</compile_context>

<pallas_src>
import numpy as np

import jax
import jax.numpy as jnp
from jax.experimental import pallas as pl
from jax.experimental.pallas import tpu as pltpu


def _identity_dma_kernel(x_hbm_ref, o_hbm_ref, sem):
    # One HBM->HBM DMA of the whole slab; no VMEM staging, no vreg traffic.
    cp = pltpu.make_async_copy(x_hbm_ref, o_hbm_ref, sem)
    cp.start()
    cp.wait()


def dn3_base_forward(x, return_features=True):
    """Forward pass of DN3BaseModel (identity on the base class).

    Args:
      x: jnp array of shape (batch, channels, samples), any dtype.
      return_features: kept for API parity with the torch module (ignored).

    Returns:
      Array with identical shape/dtype/values to `x`.
    """
    return pl.pallas_call(
        _identity_dma_kernel,
        out_shape=jax.ShapeDtypeStruct(x.shape, x.dtype),
        in_specs=[pl.BlockSpec(memory_space=pl.ANY)],
        out_specs=pl.BlockSpec(memory_space=pl.ANY),
        scratch_shapes=[pltpu.SemaphoreType.DMA],
    )(x)


class DN3BaseModelJax:
    """Minimal JAX mirror of DN3BaseModel's constructor state.

    The base class registers no parameters, so there is nothing to
    deterministically initialize beyond the stored config.
    """

    def __init__(self, samples, channels, return_features=True):
        self.samples = samples
        self.channels = channels
        self.return_features = return_features

    def __call__(self, x):
        assert x.shape[1] == self.channels and x.shape[2] == self.samples, (
            f"expected (B, {self.channels}, {self.samples}), got {x.shape}"
        )
        return dn3_base_forward(x, self.return_features)

    def internal_loss(self, forward_pass_tensors):
        return None


if __name__ == "__main__":
    # Small shapes consistent with the module: batch=2, channels=4, samples=16.
    batch, channels, samples = 2, 4, 16
    key = jax.random.PRNGKey(0)
    x = jax.random.normal(key, (batch, channels, samples), dtype=jnp.float32)
    x_ref = np.asarray(x)

    model = DN3BaseModelJax(samples=samples, channels=channels, return_features=True)
    y = model(x)
    y = jax.block_until_ready(y)

    # Sanity: identity pass-through must be exact.
    assert y.shape == x_ref.shape and y.dtype == x_ref.dtype
    assert np.array_equal(np.asarray(y), x_ref)

    print("KERNEL_OK")
</pallas_src>

<mosaic_0001>
module attributes {stable_mosaic.version = 11 : i64} {
  func.func @_identity_dma_kernel(%arg0: memref<2x4x16xf32, #tpu.memory_space<any>>, %arg1: memref<2x4x16xf32, #tpu.memory_space<any>>, %arg2: memref<!tpu.dma_semaphore, #tpu.memory_space<semaphore_mem>>) attributes {dimension_semantics = [], scalar_prefetch = 0 : i64, scratch_operands = 1 : i64, tpu.core_type = #tpu.core_type<tc>} {
    tpu.enqueue_dma source(%arg0 : memref<2x4x16xf32, #tpu.memory_space<any>>) target(%arg1 : memref<2x4x16xf32, #tpu.memory_space<any>>) target_semaphore(%arg2 : memref<!tpu.dma_semaphore, #tpu.memory_space<semaphore_mem>>)
    tpu.wait_dma2 semaphore(%arg2 : memref<!tpu.dma_semaphore, #tpu.memory_space<semaphore_mem>>) src(%arg0 : memref<2x4x16xf32, #tpu.memory_space<any>>) dst(%arg1 : memref<2x4x16xf32, #tpu.memory_space<any>>)
    return
  }
}

</mosaic_0001>

<bundles_post_ra>
// kernel: tpu_custom_call.1
= control target key start
LH: loop header
LB: loop body
LE: loop exit
PB: predicated region body
PF: predicated region fallthrough
CT: control target
= control target key end

     0   :  { %s35_s6 = smov [#allocation2]   ;;  %s36_s7 = smov [#allocation3]   ;;  %s54_s0 = inlined_call_operand.hbm [shape: f32[2,4,16], index: 0, kind: input, shape index: {}]   ;;  %s55_s1 = inlined_call_operand.hbm [shape: f32[2,4,16], index: 1, kind: output, shape index: {}]  }
   0x1   :  { %s37_s8 = smov 0  }
   0x2   :  { %18 = dma.general %s54_s0, 128, %s55_s1, %s35_s6, %s36_s7, [#allocation4], %s37_s8, 0  }
   0x3   :  { %33 = dma.done.wait [#allocation2], 128 }
   0x4   :  { %34 = vsyncadd [#allocation2], 4294967168 }
   0x5   :  { %23 = vsyncmov [#allocation2] }
   0x8   :  { %s24_s13 = vpop.sfrf %23 }
   0x9   :  { %p29_p0 = scmp.ne.s32.totalorder %s24_s13, 0 }
   0xb   :  { %28 = shalt.err (%p29_p0)  }

</bundles_post_ra>
